<compile_context>
chip_gen: v5e
topology: v5e:2x2
jax: 0.10.0
libtpu: 0.0.40
codegen_flags: <defaults>
</compile_context>

<pallas_src>
import math

import jax
import jax.numpy as jnp
from jax.experimental import pallas as pl
from jax.experimental.pallas import tpu as pltpu

LOG2PI = math.log(2.0 * math.pi)

_LANE = 128
# Double-buffered tile budget / scoped-VMEM limit, sized against the REAL
# (128-lane-padded) block footprints so they hold on v5e/v6e (128 MiB) and
# v7x (64 MiB physical, 32 MiB default scoped) alike.
_TILE_VMEM_BUDGET = 24 * 1024 * 1024
_VMEM_LIMIT_BYTES = 48 * 1024 * 1024


def _diag_normal_nll_kernel(x_ref, p_ref, out_ref):
    C = x_ref.shape[-1]

    # Slice the params ref first, then cast per operand (no full-tile f32 copy).
    x = x_ref[...].astype(jnp.float32)
    mu = p_ref[:, :C].astype(jnp.float32)
    logsigma = jnp.clip(p_ref[:, C:].astype(jnp.float32), -7.0, 5.0)

    # (x - mu) / exp(ls) == (x - mu) * exp(-ls); exp goes to the EUP slot.
    z = (x - mu) * jnp.exp(-logsigma)

    # sum_c [0.5*(z^2 + log2pi) + ls] == 0.5 * sum_c (z^2 + 2*ls) + 0.5*C*log2pi
    # Single fused reduction, executed on the MXU (ones-vector matmul) so the
    # XLU stays free; f32 accumulation even for bf16 inputs.
    t = z * z + 2.0 * logsigma
    ones = jnp.ones((C, 1), dtype=jnp.float32)
    s = jnp.dot(t, ones, preferred_element_type=jnp.float32)

    out_ref[...] = (0.5 * s + 0.5 * C * LOG2PI).astype(out_ref.dtype)


def diagonal_normal_nll(x, params, *, rows_per_tile=8192):
    """Diagonal normal negative log likelihood.

    Args:
        x:      [batch, time, channel]
        params: [batch, time, 2*channel]  (mu = params[..., :C], logsigma = rest)
    Returns:
        [batch, time] float32 negative log-likelihood summed over channel.
    """
    B, T, C = x.shape
    assert params.shape == (B, T, 2 * C)
    BT = B * T

    # Free, contiguous reshapes only — no wrapper-side slicing of params.
    xf = x.reshape(BT, C)
    pf = params.reshape(BT, 2 * C)

    x_item = jnp.dtype(x.dtype).itemsize
    p_item = jnp.dtype(params.dtype).itemsize

    def padded_row_bytes(width, itemsize):
        return -(-width // _LANE) * _LANE * itemsize

    # Real double-buffered bytes per row, including 128-lane padding of each
    # block (x, params, f32 out).
    bytes_per_row = 2 * (padded_row_bytes(C, x_item)
                         + padded_row_bytes(2 * C, p_item)
                         + padded_row_bytes(1, 4))

    # Dtype-aware sublane packing: 8 rows (f32) / 16 (bf16) / 32 (int8/fp8).
    sub = 8 * (4 // min(x_item, p_item))

    tm_budget = max(sub, _TILE_VMEM_BUDGET // bytes_per_row)
    tm_cap = max(sub, min(rows_per_tile, tm_budget))

    if BT <= tm_cap:
        # One tile covers everything; still split in two when there is enough
        # work so the row axis shards across both TensorCores on v7x
        # (neutral on single-TC v5e/v6e).
        steps = 2 if BT >= 2048 else 1
    else:
        steps = pl.cdiv(BT, tm_cap)
        if steps % 2:
            steps += 1  # even step count -> balanced 2-TC split on v7x

    if steps == 1:
        tm = BT  # full extent: no alignment requirement
    else:
        tm = min(BT, -(-pl.cdiv(BT, steps) // sub) * sub)  # sublane-aligned

    grid = (pl.cdiv(BT, tm),)

    out = pl.pallas_call(
        _diag_normal_nll_kernel,
        out_shape=jax.ShapeDtypeStruct((BT, 1), jnp.float32),
        grid=grid,
        in_specs=[
            pl.BlockSpec((tm, C), lambda i: (i, 0)),
            pl.BlockSpec((tm, 2 * C), lambda i: (i, 0)),
        ],
        out_specs=pl.BlockSpec((tm, 1), lambda i: (i, 0)),
        compiler_params=pltpu.CompilerParams(
            dimension_semantics=("parallel",),
            vmem_limit_bytes=_VMEM_LIMIT_BYTES,
        ),
    )(xf, pf)

    return out.reshape(B, T)


def _reference_nll(x, params):
    C = x.shape[-1]
    x = x.astype(jnp.float32)
    params = params.astype(jnp.float32)
    mu, logsigma = params[..., :C], params[..., C:]
    logsigma = jnp.clip(logsigma, -7.0, 5.0)
    loglik = 0.5 * (((x - mu) / jnp.exp(logsigma)) ** 2 + LOG2PI) + logsigma
    return loglik.sum(-1)


if __name__ == "__main__":
    key = jax.random.PRNGKey(0)
    kx, kp, kx2, kp2, kx3, kp3 = jax.random.split(key, 6)

    # Case 1: small shapes consistent with the module: batch=2, time=8, channel=32.
    B, T, C = 2, 8, 32
    x = jax.random.normal(kx, (B, T, C), dtype=jnp.float32)
    # DiagonalNormal has no learned parameters; `params` is the (mu, logsigma)
    # tensor produced upstream — synthesize it deterministically.
    params = jax.random.normal(kp, (B, T, 2 * C), dtype=jnp.float32)

    nll = jax.block_until_ready(diagonal_normal_nll(x, params))
    ref = _reference_nll(x, params)
    assert nll.shape == (B, T)
    assert nll.dtype == jnp.float32
    assert jnp.allclose(nll, ref, atol=1e-3, rtol=1e-3)

    # Case 2: awkward row count with a multi-step grid (masked tail block,
    # pipelined path, even-step rounding).
    B2, T2, C2 = 3, 17, 32
    x2 = jax.random.normal(kx2, (B2, T2, C2), dtype=jnp.float32)
    params2 = jax.random.normal(kp2, (B2, T2, 2 * C2), dtype=jnp.float32)

    nll2 = jax.block_until_ready(diagonal_normal_nll(x2, params2, rows_per_tile=16))
    ref2 = _reference_nll(x2, params2)
    assert nll2.shape == (B2, T2)
    assert jnp.allclose(nll2, ref2, atol=1e-3, rtol=1e-3)

    # Case 3: bf16 inputs — exercises the dtype-aware sublane alignment,
    # slice-before-cast, f32 accumulation and forced-f32 output.
    B3, T3, C3 = 2, 40, 32
    x3 = jax.random.normal(kx3, (B3, T3, C3), dtype=jnp.float32).astype(jnp.bfloat16)
    params3 = jax.random.normal(kp3, (B3, T3, 2 * C3), dtype=jnp.float32).astype(jnp.bfloat16)

    nll3 = jax.block_until_ready(diagonal_normal_nll(x3, params3, rows_per_tile=32))
    ref3 = _reference_nll(x3, params3)
    assert nll3.shape == (B3, T3)
    assert nll3.dtype == jnp.float32
    assert jnp.allclose(nll3, ref3, atol=1e-2, rtol=1e-3)

    print("KERNEL_OK")
</pallas_src>

<mosaic_0001>
module attributes {stable_mosaic.version = 11 : i64} {
  func.func @_diag_normal_nll_kernel(%arg0: i32, %arg1: memref<16x32xf32, #tpu.memory_space<vmem>>, %arg2: memref<16x64xf32, #tpu.memory_space<vmem>>, %arg3: memref<16x1xf32, #tpu.memory_space<vmem>>) attributes {dimension_semantics = [#tpu.dimension_semantics<parallel>], iteration_bounds = array<i64: 1>, scalar_prefetch = 0 : i64, scratch_operands = 0 : i64, tpu.core_type = #tpu.core_type<tc>, window_params = [{transform_indices = @transform_0, window_bounds = array<i64: 16, 32>}, {transform_indices = @transform_1, window_bounds = array<i64: 16, 64>}, {transform_indices = @transform_2, window_bounds = array<i64: 16, 1>}]} {
    %c0 = arith.constant 0 : index
    %c0_0 = arith.constant 0 : index
    %0 = vector.load %arg1[%c0, %c0_0] : memref<16x32xf32, #tpu.memory_space<vmem>>, vector<16x32xf32>
    %c0_1 = arith.constant 0 : index
    %c0_2 = arith.constant 0 : index
    %1 = vector.load %arg2[%c0_1, %c0_2] : memref<16x64xf32, #tpu.memory_space<vmem>>, vector<16x32xf32>
    %c0_3 = arith.constant 0 : index
    %c32 = arith.constant 32 : index
    %2 = vector.load %arg2[%c0_3, %c32] : memref<16x64xf32, #tpu.memory_space<vmem>>, vector<16x32xf32>
    %cst = arith.constant -7.000000e+00 : f32
    %cst_4 = arith.constant 5.000000e+00 : f32
    %3 = vector.broadcast %cst : f32 to vector<16x32xf32>
    %4 = arith.maximumf %3, %2 : vector<16x32xf32>
    %5 = vector.broadcast %cst_4 : f32 to vector<16x32xf32>
    %6 = arith.minimumf %5, %4 : vector<16x32xf32>
    %7 = arith.subf %0, %1 : vector<16x32xf32>
    %cst_5 = arith.constant 0.000000e+00 : f32
    %8 = vector.broadcast %cst_5 : f32 to vector<16x32xf32>
    %9 = arith.subf %8, %6 : vector<16x32xf32>
    %10 = math.exp %9 : vector<16x32xf32>
    %11 = arith.mulf %7, %10 : vector<16x32xf32>
    %12 = arith.mulf %11, %11 : vector<16x32xf32>
    %cst_6 = arith.constant 2.000000e+00 : f32
    %13 = vector.broadcast %cst_6 : f32 to vector<16x32xf32>
    %14 = arith.mulf %13, %6 : vector<16x32xf32>
    %15 = arith.addf %12, %14 : vector<16x32xf32>
    %cst_7 = arith.constant 1.000000e+00 : f32
    %16 = vector.broadcast %cst_7 : f32 to vector<32x1xf32>
    %cst_8 = arith.constant dense<0.000000e+00> : vector<16x1xf32>
    %17 = tpu.matmul %15, %16, %cst_8 {dimension_numbers = #tpu.dot_dimension_numbers<[1], [0], [0], [1], [0, 0, 1, 1], [], []>} : vector<16x32xf32>, vector<32x1xf32>, vector<16x1xf32> -> vector<16x1xf32>
    %cst_9 = arith.constant 5.000000e-01 : f32
    %18 = vector.broadcast %cst_9 : f32 to vector<16x1xf32>
    %19 = arith.mulf %18, %17 : vector<16x1xf32>
    %cst_10 = arith.constant 29.4060326 : f32
    %20 = vector.broadcast %cst_10 : f32 to vector<16x1xf32>
    %21 = arith.addf %19, %20 : vector<16x1xf32>
    %c0_11 = arith.constant 0 : index
    %c0_12 = arith.constant 0 : index
    %22 = vector.load %arg3[%c0_11, %c0_12] : memref<16x1xf32, #tpu.memory_space<vmem>>, vector<16x1xf32>
    tpu.vector_store %arg3[%c0_11, %c0_12], %21 {strides = array<i32>} : memref<16x1xf32, #tpu.memory_space<vmem>>, vector<16x1xf32>,
    return
  }
  func.func @transform_0(%arg0: i32) -> (i32, i32) {
    %c0_i32 = arith.constant 0 : i32
    %c0_i32_0 = arith.constant 0 : i32
    return %arg0, %c0_i32 : i32, i32
  }
  func.func @transform_1(%arg0: i32) -> (i32, i32) {
    %c0_i32 = arith.constant 0 : i32
    %c0_i32_0 = arith.constant 0 : i32
    return %arg0, %c0_i32 : i32, i32
  }
  func.func @transform_2(%arg0: i32) -> (i32, i32) {
    %c0_i32 = arith.constant 0 : i32
    %c0_i32_0 = arith.constant 0 : i32
    return %arg0, %c0_i32 : i32, i32
  }
}

</mosaic_0001>

<bundles_post_ra>
// kernel: tpu_custom_call.1
= control target key start
LH: loop header
LB: loop body
LE: loop exit
PB: predicated region body
PF: predicated region fallthrough
CT: control target
= control target key end

     0   :  { %7 = vsyncpa [#allocation3], 0  ;;  %s227_s0 = inlined_call_operand.hbm [shape: f32[16,32], index: 0, kind: input, shape index: {}]   ;;  %s228_s1 = inlined_call_operand.hbm [shape: f32[16,64], index: 1, kind: input, shape index: {}]   ;;  %s229_s2 = inlined_call_operand.vmem [shape: f32[16,1], index: 2, kind: output, shape index: {}]  }
   0x1   :  { %s13_s11 = sshll.u32 %s227_s0, 4  ;;  %s14_s11 = int_to_ptr.hbm [resolvable:$true] %s13_s11 }
   0x2   :  { %8 = vsyncpa [#allocation5], 0  ;;  %s194_s12 = smov [#allocation2]   ;;  %s26_s16 = sshll.u32 %s228_s1, 4  ;;  %s27_s16 = int_to_ptr.hbm [resolvable:$true] %s26_s16 }
   0x3   :  { %s15_s13 = sshll.u32 %s194_s12, 4  ;;  %s195_s17 = smov 128   ;;  %s16_s13 = int_to_ptr.vmem [resolvable:$true] %s15_s13 }
   0x4   :  { %s196_s18 = smov 8   ;;  %s197_s19 = smov [#allocation4]  }
   0x5   :  { %21 = dma.hbm_to_vmem [thread:$0]  %s14_s11, 256, %s16_s13, [#allocation3], %s195_s17, %s195_s17, %s196_s18  }
   0x6   :  { %s28_s20 = sshll.u32 %s197_s19, 4  ;;  %s29_s20 = int_to_ptr.vmem [resolvable:$true] %s28_s20 }
   0x7   :  { %34 = dma.hbm_to_vmem [thread:$0]  %s27_s16, 256, %s29_s20, [#allocation5], %s195_s17, %s195_s17, %s196_s18  }
   0x8   :  { %190 = dma.done.wait [#allocation3], 256  }
   0x9   :  { %191 = vsyncadd [#allocation3], 4294967040 }
   0xa   :  { %192 = dma.done.wait [#allocation5], 256  }
   0xb   :  { %193 = vsyncadd [#allocation5], 4294967040  ;;  %v198_v0 = vmov 1.0   ;;  %v45_v1 = vld [vmem:[#allocation4] sm:$0xff]  ;;  %v46_v2 = vld [vmem:[#allocation4 + $0x8] sm:$0xff]  ;;  %s199_s0 = smov 96  }
   0xc   :  { %102 = vmatpush.msra.mxu0 %v198_v0  ;;  %128 = vmatpush.msra.mxu1 %v198_v0  ;;  %v47_v3 = vmax.f32 %v45_v1, -7.0  ;;  %v48_v4 = vmax.f32 %v46_v2, -7.0  ;;  %v43_v15 = vld [vmem:[#allocation2] sm:$0xff]  ;;  %v44_v20 = vld [vmem:[#allocation2 + $0x8] sm:$0xff]  ;;  %vm83_vm0 = vcmask 261120   ;;  %vm117_vm1 = vcmask 7168  }
   0xd   :  { %v51_v16 = vsub.f32 %v43_v15, %v45_v1  ;;  %v52_v23 = vsub.f32 %v44_v20, %v46_v2 }
   0xe   :  { %103 = vmatpush.msra.mxu0 %v198_v0  ;;  %129 = vmatpush.msra.mxu1 %v198_v0  ;;  %v49_v5 = vmin.f32 %v47_v3, 5.0  ;;  %v50_v6 = vmin.f32 %v48_v4, 5.0 }
  0x10   :  { %104 = vmatpush.msra.mxu0 %v198_v0  ;;  %130 = vmatpush.msra.mxu1 %v198_v0  ;;  %v53_v7 = vsub.f32 0.0, %v49_v5  ;;  %v71_v8 = vmul.f32 2.0, %v49_v5  ;;  %v54_v10 = vsub.f32 0.0, %v50_v6  ;;  %v72_v12 = vmul.f32 2.0, %v50_v6 }
  0x12   :  { %105 = vmatpush.msra.mxu0 %v198_v0  ;;  %131 = vmatpush.msra.mxu1 %v198_v0  ;;  %v55_v9 = vmul.f32 1.442695, %v53_v7  ;;  %v57_v11 = vmul.f32 1.442695, %v54_v10 }
  0x13   :  { %75 = vrot.lane.b32.xlu1 %v71_v8, %s199_s0 }
  0x14   :  { %138 = vpow2.f32 %v55_v9 }
  0x15   :  { %140 = vpow2.f32 %v57_v11 }
  0x1a   :  { %v139_v13 = vpop.eup %138 }
  0x1b   :  { %77 = vrot.lane.b32.xlu1 %v72_v12, %s199_s0  ;;  %61 = vrot.lane.b32.xlu0 %v139_v13, %s199_s0  ;;  %v141_v14 = vpop.eup %140 }
  0x23   :  { %63 = vrot.lane.b32.xlu0 %v141_v14, %s199_s0 }
  0x85   :  { %v76_v18 = vpop.permute.xlu1 %75 }
  0x8d   :  { %v62_v17 = vpop.permute.xlu0 %61  ;;  %v78_v26 = vpop.permute.xlu1 %77 }
  0x8e   :  { %v67_v19 = vmul.f32 %v62_v17, %v51_v16 }
  0x90   :  { %v69_v21 = vmul.f32 %v67_v19, %v67_v19 }
  0x92   :  { %v81_v22 = vadd.f32 %v76_v18, %v69_v21 }
  0x94   :  { %126 = vmatmul.msk.f32.vlgmr.msra.gmra.mxu0 %vm83_vm0, %v81_v22 }
  0x95   :  { %v64_v24 = vpop.permute.xlu0 %63 }
  0x96   :  { %v68_v25 = vmul.f32 %v64_v24, %v52_v23 }
  0x98   :  { %v70_v27 = vmul.f32 %v68_v25, %v68_v25 }
  0x9a   :  { %v82_v28 = vadd.f32 %v78_v26, %v70_v27 }
  0x9c   :  { %127 = vmatmul.msk.f32.vlgmr.msra.gmra.mxu1 %vm83_vm0, %v82_v28 }
 0x111   :  { %v107_v29 = vpop.f32.mrf.mxu0 }
 0x112   :  { %v113_v30 = vmul.f32 0.5, %v107_v29 }
 0x114   :  { %v115_v31 = vadd.f32 29.406033, %v113_v30 }
 0x116   :  { %118 = vst.msk [vmem:[%s229_s2] sm:$0xff] %vm117_vm1, %v115_v31 }
 0x119   :  { %v110_v32 = vpop.f32.mrf.mxu1 }
 0x11a   :  { %v114_v33 = vmul.f32 0.5, %v110_v32 }
 0x11c   :  { %v116_v34 = vadd.f32 29.406033, %v114_v33 }
 0x11e   :  { %119 = vst.msk [vmem:[%s229_s2 + $0x8] sm:$0xff] %vm117_vm1, %v116_v34 }
 0x11f   :  { %124 = vsyncpa [#allocation3], 1 }
 0x120   :  { %125 = vsyncpa [#allocation5], 1 }

</bundles_post_ra>
